<compile_context>
chip_gen: v7x
topology: tpu7x:2x2x1
jax: 0.10.0
libtpu: 0.0.40
codegen_flags: <defaults>
</compile_context>

<pallas_src>
import math
from functools import partial

import jax
import jax.numpy as jnp
import numpy as np
from jax.experimental import pallas as pl
from jax.experimental.pallas import tpu as pltpu


def _make_ls(l_max: int) -> np.ndarray:
    """Degree table: ls[l*(l+1)/2 + m] = l for even l, m in [-l, l].
    Slots not covered by an even degree stay 0 (same as the PyTorch buffer)."""
    n_coeffs = l_max * (l_max + 3) // 2 + 1
    ls = np.zeros((n_coeffs,), dtype=np.int32)
    for l in range(0, l_max + 1, 2):
        for m in range(-l, l + 1):
            ls[int(0.5 * l * (l + 1) + m)] = l
    return ls


def _sphconv_kernel(deg_ref, x_ref, w_ref, scale_ref, o_ref):
    # deg_ref:   (K,)            int32 SMEM (scalar prefetch; used by index_maps)
    # x_ref:     (1, c_in,  TB)  VMEM  -- x transposed to [k, i, b]
    # w_ref:     (1, c_out, c_in) VMEM -- raw per-degree weight matrix
    # scale_ref: (K,)            f32 SMEM -- sqrt(pi / (2*ls[k] + 1))
    # o_ref:     (1, c_out, TB)  VMEM
    k = pl.program_id(0)
    y = jnp.dot(w_ref[0], x_ref[0], preferred_element_type=jnp.float32)   # MXU
    o_ref[0] = (scale_ref[k] * y).astype(o_ref.dtype)


@partial(jax.jit, static_argnums=(2,))
def sphconv_forward(x: jnp.ndarray, weights: jnp.ndarray, l_max: int) -> jnp.ndarray:
    """x: (B, c_in, K); weights: (c_out, c_in, l_max//2 + 1) -> (B, c_out, K)."""
    B, c_in, K = x.shape
    c_out, c_in_w, n_deg = weights.shape
    assert c_in_w == c_in and n_deg == l_max // 2 + 1

    ls = _make_ls(l_max)
    assert ls.shape[0] == K, "n_coeffs mismatch with l_max"

    deg_of_k = jnp.asarray(ls // 2, dtype=jnp.int32)                           # (K,)
    scale_k = jnp.asarray(np.sqrt(math.pi / (2.0 * ls + 1.0)), jnp.float32)    # (K,)

    # Keep the caller's dtype: bf16 stays bf16 (native MXU operands, f32 accum).
    compute_dtype = x.dtype
    w_t = jnp.transpose(weights, (2, 0, 1)).astype(compute_dtype)              # (n_deg, c_out, c_in)

    # Lane-dense layout: batch last (wrapper-side layout plumbing).
    x_t = jnp.transpose(x, (2, 1, 0))                                          # (K, c_in, B)

    # Batch (lane) tiling: 128-multiples up to 1024 lanes per grid step; pad B.
    LANE = 128
    if B <= LANE:
        tb, b_pad = B, B                      # block == full array dim (allowed)
    else:
        tb = min(1024, pl.cdiv(B, LANE) * LANE)
        b_pad = pl.cdiv(B, tb) * tb
    if b_pad != B:
        x_t = jnp.pad(x_t, ((0, 0), (0, 0), (0, b_pad - B)))
    n_bt = b_pad // tb

    grid_spec = pltpu.PrefetchScalarGridSpec(
        num_scalar_prefetch=1,                 # degree-of-k table
        grid=(K, n_bt),
        in_specs=[
            # x tile: coefficient k, batch tile j  -> lane-dense (c_in, TB)
            pl.BlockSpec((1, c_in, tb), lambda k, j, deg: (k, 0, j)),
            # weight tile: selected by degree; re-DMA'd only when deg[k] changes
            pl.BlockSpec((1, c_out, c_in), lambda k, j, deg: (deg[k], 0, 0)),
            # per-k scale table lives in SMEM (whole array, read as a scalar)
            pl.BlockSpec(memory_space=pltpu.MemorySpace.SMEM),
        ],
        out_specs=pl.BlockSpec((1, c_out, tb), lambda k, j, deg: (k, 0, j)),
    )

    itemsize = jnp.dtype(compute_dtype).itemsize
    cost = pl.CostEstimate(
        flops=2 * b_pad * c_out * c_in * K,
        transcendentals=0,
        bytes_accessed=int(x_t.size * itemsize + w_t.size * itemsize
                           + K * c_out * b_pad * itemsize),
    )

    out_t = pl.pallas_call(
        _sphconv_kernel,
        out_shape=jax.ShapeDtypeStruct((K, c_out, b_pad), compute_dtype),
        grid_spec=grid_spec,
        compiler_params=pltpu.CompilerParams(
            dimension_semantics=("parallel", "parallel")),   # v7x: 2 TCs share grid
        cost_estimate=cost,
    )(deg_of_k, x_t, w_t, scale_k)

    return jnp.transpose(out_t, (2, 1, 0))[:B]               # (B, c_out, K)


if __name__ == "__main__":
    l_max, c_in, c_out, B = 4, 4, 8, 2
    n_deg = l_max // 2 + 1
    K = l_max * (l_max + 3) // 2 + 1          # 15

    key = jax.random.PRNGKey(0)
    kx, kw = jax.random.split(key)
    # Test data is rounded to bf16-exact f32 values so the correctness check is
    # independent of how many bf16 passes the MXU uses for an f32 matmul.
    x = jax.random.normal(kx, (B, c_in, K), jnp.float32)
    x = x.astype(jnp.bfloat16).astype(jnp.float32)
    # torch.nn.init.uniform_ -> U[0, 1); deterministic synthetic init here.
    weights = jax.random.uniform(kw, (c_out, c_in, n_deg), dtype=jnp.float32)
    weights = weights.astype(jnp.bfloat16).astype(jnp.float32)

    ys = jax.block_until_ready(sphconv_forward(x, weights, l_max))

    # Pure-JAX reference: exact f32 broadcast-multiply-sum (same math as PyTorch).
    ls = jnp.asarray(_make_ls(l_max))
    scale = jnp.sqrt(math.pi / (2.0 * ls.astype(jnp.float32) + 1.0))
    w_exp = weights[:, :, ls // 2] * scale[None, None, :]
    ref = jnp.sum(w_exp[None, :, :, :] * x[:, None, :, :], axis=2)

    assert ys.shape == (B, c_out, K)
    assert ys.dtype == x.dtype
    assert jnp.allclose(ys, ref, atol=1e-4, rtol=1e-4), float(jnp.max(jnp.abs(ys - ref)))

    print("KERNEL_OK")
</pallas_src>

<mosaic_0001>
module attributes {stable_mosaic.version = 11 : i64} {
  func.func @_sphconv_kernel(%arg0: i32, %arg1: i32, %arg2: memref<15xi32, #tpu.memory_space<smem>>, %arg3: memref<1x4x2xf32, #tpu.memory_space<vmem>>, %arg4: memref<1x8x4xf32, #tpu.memory_space<vmem>>, %arg5: memref<15xf32, #tpu.memory_space<smem>>, %arg6: memref<1x8x2xf32, #tpu.memory_space<vmem>>) attributes {dimension_semantics = [#tpu.dimension_semantics<parallel>, #tpu.dimension_semantics<parallel>], iteration_bounds = array<i64: 15, 1>, scalar_prefetch = 1 : i64, scratch_operands = 0 : i64, tpu.core_type = #tpu.core_type<tc>, window_params = [{transform_indices = @transform_0, window_bounds = array<i64: 1, 4, 2>}, {transform_indices = @transform_1, window_bounds = array<i64: 1, 8, 4>}, {transform_indices = @transform_2, window_bounds = array<i64: 15>}, {transform_indices = @transform_3, window_bounds = array<i64: 1, 8, 2>}]} {
    %c0 = arith.constant 0 : index
    %c0_0 = arith.constant 0 : index
    %c0_1 = arith.constant 0 : index
    %0 = vector.load %arg4[%c0, %c0_0, %c0_1] : memref<1x8x4xf32, #tpu.memory_space<vmem>>, vector<1x8x4xf32>
    %1 = vector.shape_cast %0 : vector<1x8x4xf32> to vector<8x4xf32>
    %c0_2 = arith.constant 0 : index
    %c0_3 = arith.constant 0 : index
    %c0_4 = arith.constant 0 : index
    %2 = vector.load %arg3[%c0_2, %c0_3, %c0_4] : memref<1x4x2xf32, #tpu.memory_space<vmem>>, vector<1x4x2xf32>
    %3 = vector.shape_cast %2 : vector<1x4x2xf32> to vector<4x2xf32>
    %cst = arith.constant dense<0.000000e+00> : vector<8x2xf32>
    %4 = tpu.matmul %1, %3, %cst {dimension_numbers = #tpu.dot_dimension_numbers<[1], [0], [0], [1], [0, 0, 1, 1], [], []>} : vector<8x4xf32>, vector<4x2xf32>, vector<8x2xf32> -> vector<8x2xf32>
    %5 = arith.index_cast %arg0 : i32 to index
    %6 = memref.load %arg5[%5] : memref<15xf32, #tpu.memory_space<smem>>
    %7 = vector.broadcast %6 : f32 to vector<8x2xf32>
    %8 = arith.mulf %7, %4 : vector<8x2xf32>
    %c0_5 = arith.constant 0 : index
    %c0_6 = arith.constant 0 : index
    %c0_7 = arith.constant 0 : index
    %9 = vector.load %arg6[%c0_5, %c0_6, %c0_7] : memref<1x8x2xf32, #tpu.memory_space<vmem>>, vector<1x8x2xf32>
    %10 = vector.shape_cast %9 : vector<1x8x2xf32> to vector<8x2xf32>
    %11 = vector.shape_cast %8 : vector<8x2xf32> to vector<1x8x2xf32>
    tpu.vector_store %arg6[%c0_5, %c0_6, %c0_7], %11 {strides = array<i32>} : memref<1x8x2xf32, #tpu.memory_space<vmem>>, vector<1x8x2xf32>,
    return
  }
  func.func @transform_0(%arg0: i32, %arg1: i32, %arg2: memref<15xi32, #tpu.memory_space<smem>>) -> (i32, i32, i32) {
    %c0_i32 = arith.constant 0 : i32
    %c0_i32_0 = arith.constant 0 : i32
    return %arg0, %c0_i32, %arg1 : i32, i32, i32
  }
  func.func @transform_1(%arg0: i32, %arg1: i32, %arg2: memref<15xi32, #tpu.memory_space<smem>>) -> (i32, i32, i32) {
    %0 = arith.index_cast %arg0 : i32 to index
    %1 = memref.load %arg2[%0] : memref<15xi32, #tpu.memory_space<smem>>
    %c0_i32 = arith.constant 0 : i32
    %c0_i32_0 = arith.constant 0 : i32
    %c0_i32_1 = arith.constant 0 : i32
    return %1, %c0_i32, %c0_i32_0 : i32, i32, i32
  }
  func.func @transform_2(%arg0: i32, %arg1: i32, %arg2: memref<15xi32, #tpu.memory_space<smem>>) -> i32 {
    %c0_i32 = arith.constant 0 : i32
    %c0_i32_0 = arith.constant 0 : i32
    return %c0_i32 : i32
  }
  func.func @transform_3(%arg0: i32, %arg1: i32, %arg2: memref<15xi32, #tpu.memory_space<smem>>) -> (i32, i32, i32) {
    %c0_i32 = arith.constant 0 : i32
    %c0_i32_0 = arith.constant 0 : i32
    return %arg0, %c0_i32, %arg1 : i32, i32, i32
  }
}

</mosaic_0001>

<bundles_post_ra>
// kernel: sphconv_forward.1
= control target key start
LH: loop header
LB: loop body
LE: loop exit
PB: predicated region body
PF: predicated region fallthrough
CT: control target
= control target key end

     0   :  { %s638_s0 = inlined_call_operand.vmem [shape: s32[15], index: 0, kind: input, shape index: {}]   ;;  %s639_s1 = inlined_call_operand.vmem [shape: f32[15,4,2], index: 1, kind: input, shape index: {}]   ;;  %s640_s2 = inlined_call_operand.vmem [shape: f32[3,8,4], index: 2, kind: input, shape index: {}]   ;;  %s641_s3 = inlined_call_operand.vmem [shape: f32[15], index: 3, kind: input, shape index: {}]   ;;  %s642_s4 = inlined_call_operand.vmem [shape: f32[15,8,2], index: 4, kind: output, shape index: {}]  }
   0x1   :  { %s9_s17 = sshll.u32 %s638_s0, 4  ;;  %s10_s17 = int_to_ptr.vmem [resolvable:$true] %s9_s17 }
   0x2   :  { %s485_s18 = scalar_lea.vmem %s10_s17, 16  ;;  %p490_p1 = scmp.lt.s32.totalorder %s10_s17, %s10_s17 }
   0x3   :  { %p486_p0 = scmp.ne.s32.totalorder %s10_s17, %s485_s18  ;;  %p491_p2 = scmp.lt.s32.totalorder %s485_s18, %s485_s18 }
   0x5   :  { %p492_p3 = por %p491_p2, %p490_p1 }
   0x7   :  { %p493_p4 = pnand %p492_p3, %p486_p0 }
   0x9   :  { %496 = shalt.err (!%p493_p4)  }
   0xa   :  { %s542_s19 = smov [#allocation3]  }
   0xb   :  { %12 = dma.vmem_to_smem %s10_s17, 16, %s542_s19, [#allocation2] }
   0xc   :  { %524 = dma.done.wait [#allocation2], 16 }
   0xd   :  { %525 = vsyncadd [#allocation2], 4294967280 }
   0xe   :  { %14 = sfence }
   0xf   :  { %15 = vsyncpa [#allocation5], 0  ;;  %s574_s20 = smov 0   ;;  %s576_s21 = smov 0  }
  0x10   :  { %s578_s22 = smov 0  }
  0x11 LB: > { %s426_s0 = sadd.s32 4294967295, %s540_s22   ;;  %s33_s23 = sadd.s32 1, %s536_s21  ;;  %s540_s22 = sphi %s578_s22, %s21_s22   ;;  %s536_s21 = sphi %s576_s21, %s646_s21   ;;  %s532_s20 = sphi %s574_s20, %s645_s20  }
  0x12   : > { %p35_p5 = scmp.ge.s32.totalorder %s33_s23, 15  ;;  %p428_p6 = scmp.ge.s32.totalorder %s540_s22, 1 }
  0x13   : > { %p143_p7 = scmp.lt.s32.totalorder %s540_s22, 16  ;;  %p599_p9 = scmp.eq.s32.totalorder %s426_s0, 0 }
  0x14   : > { %s648_s23 = smov (%p35_p5, %s33_s23), 0  ;;  %s156_s28 = sshll.u32 %s641_s3, 4  ;;  %s157_s28 = int_to_ptr.vmem [resolvable:$true] %s156_s28 }
  0x15   : > { %p595_p8 = pnand %p428_p6, %p143_p7  ;;  %s497_s29 = scalar_lea.vmem %s157_s28, 16 }
  0x16   : > { %p498_p12 = scmp.ne.s32.totalorder %s157_s28, %s497_s29  ;;  %p505_p2 = scmp.lt.s32.totalorder %s157_s28, %s157_s28 }
  0x17   : > { %p451_p10 = pneg %p595_p8  ;;  %p506_p3 = scmp.lt.s32.totalorder %s497_s29, %s497_s29 }
  0x19   : > { %p452_p11 = pnand %p599_p9, %p451_p10  ;;  %p507_p4 = por %p506_p3, %p505_p2 }
  0x1b   : > { %p499_p13 = pneg %p452_p11 }
  0x1d   : > { %p500_p0 = pnand %p499_p13, %p498_p12 }
  0x1f   : > { %p501_p1 = pneg %p500_p0 }
  0x21   : > { %p508_p5 = pnand %p507_p4, %p501_p1 }
  0x23   : > { %511 = shalt.err (!%p508_p5)
}
  0x24   : > { %s543_s30 = smov [#allocation4]   ;;  %188 = sbr.rel (%p595_p8) target bundleno = 273 (0x111), region = 32 }
  0x25   : > { %454 = dma.vmem_to_smem (!%p452_p11), %s157_s28, 16, %s543_s30, [#allocation5]  }
  0x2b   : > { %527 = dma.done.wait (%p599_p9), [#allocation5], 16  }
  0x2c   : > { %529 = vsyncadd (%p599_p9), [#allocation5], 4294967280 }
  0x2d   : > { %194 = sfence }
  0x2e   : > { %p222_p6 = scmp.lt.s32.totalorder %s532_s20, 14  ;;  %s229_s5 = sld [smem:[#allocation3 + %s532_s20]]  ;;  %v544_v0 = vmov 0.0   ;;  %vm545_vm0 = vmmov 0   ;;  %vm248_vm1 = vcmask 1043456   ;;  %vm244_vm2 = vcmask 31744  }
  0x2f   : > { %442 = vmatprep.subr.mxu0 %v544_v0  ;;  %444 = vmatprep.mubr.msk.f32.mxu0 %vm545_vm0, %v544_v0  ;;  %s322_s15 = sld [smem:[#allocation4 + %s532_s20]]  ;;  %vm325_vm3 = vcmask 15360  }
  0x30   : > { %s223_s6 = scalar_select %p222_p6, %s532_s20, 14 }
  0x32   : > { %s433_s7 = sshll.u32 %s223_s6, 2  ;;  %s435_s16 = sshll.u32 %s223_s6, 3 }
  0x33   : > { %s228_s10 = scalar_lea.vmem %s639_s1, %s433_s7  ;;  %s241_s19 = scalar_lea.vmem %s642_s4, %s435_s16 }
  0x34   : > { %v243_v1 = vld [vmem:[%s228_s10] sm:$0xf]  ;;  %p230_p7 = scmp.lt.s32.totalorder %s229_s5, 2 }
  0x35   : > { %443 = vmatpush3.msk.msra.mxu0 %vm248_vm1, %v243_v1  ;;  %v323_v3 = vstv %s322_s15 }
  0x36   : > { %s650_s5 = smov (!%p230_p7, %s229_s5), 2 }
  0x37   : > { %s434_s11 = sshll.u32 %s650_s5, 3 }
  0x38   : > { %s233_s14 = scalar_lea.vmem %s640_s2, %s434_s11 }
  0x39   : > { %v242_v2 = vld [vmem:[%s233_s14] sm:$0xff] }
  0x3a   : > { %445 = vmatmul.mubr.msk.f32.vlgmr.msra.gmra.mrb[0].mxu0 %vm244_vm2, %v242_v2 }
 0x10d   : > { %v318_v4 = vpop.f32.mrb[0].mxu0 }
 0x10e   : > { %v324_v5 = vmul.f32 %v323_v3, %v318_v4  ;;  %v446_v6 = vpop.f32.mrb[1].mxu0 }
 0x110   : > { %326 = vst.msk [vmem:[%s241_s19] sm:$0xff] %vm325_vm3, %v324_v5 }
 0x111 PF: > { %s21_s22 = sadd.s32 1, %s540_s22   ;;  %s645_s20 = smov %s536_s21 }
 0x112   : > { %p18_p8 = scmp.ge.s32.totalorder %s21_s22, 17   ;;  %s646_s21 = smov %s648_s23 }
 0x114   :  { %20 = sbr.rel (!%p18_p8) target bundleno = 17 (0x11), region = 70 }
 0x11b   :  { %352 = vsyncpa [#allocation5], 1 }
 0x11c   :  { %354 = vsyncpa [#allocation5 + $0x1], 1 }

</bundles_post_ra>
